<compile_context>
chip_gen: v6e
topology: v6e:2x2x1
jax: 0.10.0
libtpu: 0.0.40
codegen_flags: <defaults>
</compile_context>

<pallas_src>
import functools

import jax
import jax.numpy as jnp
import numpy as np
from jax import lax
from jax.experimental import pallas as pl
from jax.experimental.pallas import tpu as pltpu


# ----------------------------------------------------------------------------
# One-time probe: does pltpu.roll follow np.roll's shift direction?  Used to
# pick the correct static tap shifts (correct on either rotate convention).
# ----------------------------------------------------------------------------
@functools.lru_cache(maxsize=None)
def _roll_matches_numpy():
    def _probe(x_ref, o_ref):
        o_ref[...] = pltpu.roll(x_ref[...], 1, axis=1)

    x = jnp.arange(8 * 128, dtype=jnp.float32).reshape(8, 128)
    y = pl.pallas_call(
        _probe, out_shape=jax.ShapeDtypeStruct((8, 128), jnp.float32))(x)
    # np.roll convention: result[0, 0] == x[0, -1] == 127.
    return bool(np.asarray(y)[0, 0] == 127.0)


# ----------------------------------------------------------------------------
# Fused ResidualGroup kernel: one image per grid step, everything VMEM/vreg
# resident in a spatial-on-lanes (C, H*W) layout.
# ----------------------------------------------------------------------------
def _residual_group_kernel(x_ref,
                           w1s_ref, b1s_ref, w2s_ref, b2s_ref,
                           cw1s_ref, cb1s_ref, cw2ts_ref, cb2s_ref,
                           wft_ref, bft_ref,
                           o_ref,
                           col_ref, res_ref,
                           *, H, W, C, n_blocks, roll_np):
    HW = H * W
    inv_hw = jnp.float32(1.0 / HW)

    def conv3x3(act, w_t, bias, relu):
        """act: (C, HW) f32 -> conv3x3(act) + bias [ReLU], (C, HW) f32.

        Each of the 9 taps is the flattened activation rolled by dy*W+dx on
        the lane axis (XLU) with out-of-image pixels masked to zero (VPU),
        stored as a bf16 sublane-aligned slab of the (9C, HW) im2col scratch;
        the conv is then ONE MXU matmul with K = 9C.
        """
        pos = lax.broadcasted_iota(jnp.int32, (1, HW), 1)
        yq, xq = pos // W, pos % W
        for t in range(9):
            dy, dx = t // 3 - 1, t % 3 - 1
            d = dy * W + dx                       # flat source offset
            if d == 0:
                tap = act
            else:
                shift = (-d) % HW if roll_np else d % HW
                rolled = pltpu.roll(act, shift, axis=1)
                conds = []
                if dy == -1:
                    conds.append(yq >= 1)
                elif dy == 1:
                    conds.append(yq <= H - 2)
                if dx == -1:
                    conds.append(xq >= 1)
                elif dx == 1:
                    conds.append(xq <= W - 2)
                valid = conds[0]
                for c in conds[1:]:
                    valid = valid & c
                tap = jnp.where(valid, rolled, 0.0)
            col_ref[t * C:(t + 1) * C, :] = tap.astype(jnp.bfloat16)
        out = jnp.dot(w_t, col_ref[...],
                      preferred_element_type=jnp.float32) + bias     # (C, HW) f32
        return jnp.maximum(out, 0.0) if relu else out

    res_ref[...] = x_ref[0]                                          # (C, HW) f32

    def rcab(blk, carry):
        h = conv3x3(res_ref[...], w1s_ref[blk], b1s_ref[blk], relu=True)
        h = conv3x3(h, w2s_ref[blk], b2s_ref[blk], relu=False)
        # Channel attention on VPU/XLU (f32): squeeze + two tiny 1x1 "convs".
        pooled = jnp.sum(h, axis=1, keepdims=True) * inv_hw          # (C, 1)
        z = jnp.sum(pooled * cw1s_ref[blk], axis=0, keepdims=True)   # (1, Cr)
        z = jnp.maximum(z + cb1s_ref[blk], 0.0)
        s = jnp.sum(cw2ts_ref[blk] * z, axis=1, keepdims=True)       # (C, 1)
        s = jax.nn.sigmoid(s + cb2s_ref[blk])
        res_ref[...] = h * s + res_ref[...]                          # RCAB skip
        return carry

    lax.fori_loop(0, n_blocks, rcab, 0)

    # Final group conv + group skip; lane-dense (C, HW) store.
    out = conv3x3(res_ref[...], wft_ref[...], bft_ref[...], relu=False) + x_ref[0]
    o_ref[0] = out.astype(o_ref.dtype)


def residual_group_pallas(x_nchw, blocks, wf, bf, *, roll_np_convention=True):
    """x_nchw: (N,C,H,W) f32.  blocks: list of per-RCAB param dicts.  wf,bf: final conv."""
    N, C, H, W = x_nchw.shape
    HW = H * W
    n_blocks = len(blocks)
    Cr = blocks[0]["cw1"].shape[1]

    # Stack per-block params once; conv weights are pre-transposed (C, 9C) bf16
    # (MXU operands); biases / CA params stay f32, shaped so they broadcast
    # over the lane-dense (C, HW) activations inside the kernel.
    w1s = jnp.stack([b["w1"].T for b in blocks]).astype(jnp.bfloat16)    # (NB, C, 9C)
    w2s = jnp.stack([b["w2"].T for b in blocks]).astype(jnp.bfloat16)    # (NB, C, 9C)
    b1s = jnp.stack([b["b1"].reshape(C, 1) for b in blocks])             # (NB, C, 1)
    b2s = jnp.stack([b["b2"].reshape(C, 1) for b in blocks])             # (NB, C, 1)
    cw1s = jnp.stack([b["cw1"] for b in blocks])                         # (NB, C, Cr)
    cb1s = jnp.stack([b["cb1"] for b in blocks])                         # (NB, 1, Cr)
    cw2ts = jnp.stack([b["cw2"].T for b in blocks])                      # (NB, C, Cr)
    cb2s = jnp.stack([b["cb2"].reshape(C, 1) for b in blocks])           # (NB, C, 1)
    wft = wf.T.astype(jnp.bfloat16)                                      # (C, 9C)
    bft = bf.reshape(C, 1)                                               # (C, 1)

    x_flat = x_nchw.reshape(N, C, HW)       # NCHW -> (N, C, H*W): contiguous, free

    kern = functools.partial(_residual_group_kernel, H=H, W=W, C=C,
                             n_blocks=n_blocks, roll_np=roll_np_convention)
    out_flat = pl.pallas_call(
        kern,
        out_shape=jax.ShapeDtypeStruct((N, C, HW), x_nchw.dtype),
        grid=(N,),
        in_specs=[
            pl.BlockSpec((1, C, HW), lambda n: (n, 0, 0)),               # x (per image)
            pl.BlockSpec((n_blocks, C, 9 * C), lambda n: (0, 0, 0)),     # conv1 W^T (bf16)
            pl.BlockSpec((n_blocks, C, 1), lambda n: (0, 0, 0)),         # conv1 b
            pl.BlockSpec((n_blocks, C, 9 * C), lambda n: (0, 0, 0)),     # conv2 W^T (bf16)
            pl.BlockSpec((n_blocks, C, 1), lambda n: (0, 0, 0)),         # conv2 b
            pl.BlockSpec((n_blocks, C, Cr), lambda n: (0, 0, 0)),        # CA W1
            pl.BlockSpec((n_blocks, 1, Cr), lambda n: (0, 0, 0)),        # CA b1
            pl.BlockSpec((n_blocks, C, Cr), lambda n: (0, 0, 0)),        # CA W2^T
            pl.BlockSpec((n_blocks, C, 1), lambda n: (0, 0, 0)),         # CA b2
            pl.BlockSpec((C, 9 * C), lambda n: (0, 0)),                  # final conv W^T (bf16)
            pl.BlockSpec((C, 1), lambda n: (0, 0)),                      # final conv b
        ],
        out_specs=pl.BlockSpec((1, C, HW), lambda n: (n, 0, 0)),
        scratch_shapes=[
            pltpu.VMEM((9 * C, HW), jnp.bfloat16),    # bf16 im2col (MXU operand)
            pltpu.VMEM((C, HW), jnp.float32),         # running residual accumulator
        ],
        compiler_params=pltpu.CompilerParams(
            dimension_semantics=("parallel",),        # batch across TCs (v7x)
            vmem_limit_bytes=32 * 1024 * 1024),
    )(x_flat, w1s, b1s, w2s, b2s, cw1s, cb1s, cw2ts, cb2s, wft, bft)
    return out_flat.reshape(N, C, H, W)


# ----------------------------------------------------------------------------
# Pure-JAX reference (NCHW, f32 HIGHEST) for correctness checking.
# ----------------------------------------------------------------------------
def _conv3x3_ref(x, w_flat, b):
    C = x.shape[1]
    wk = w_flat.reshape(3, 3, C, C)                   # (dy, dx, cin, cout) = HWIO
    y = lax.conv_general_dilated(
        x, wk, window_strides=(1, 1), padding="SAME",
        dimension_numbers=("NCHW", "HWIO", "NCHW"),
        precision=lax.Precision.HIGHEST)
    return y + b.reshape(1, C, 1, 1)


def residual_group_ref(x, blocks, wf, bf):
    res = x
    for blk in blocks:
        h = jnp.maximum(_conv3x3_ref(res, blk["w1"], blk["b1"]), 0.0)
        h = _conv3x3_ref(h, blk["w2"], blk["b2"])
        pooled = jnp.mean(h, axis=(2, 3))                                     # (N, C)
        z = jnp.maximum(jnp.dot(pooled, blk["cw1"],
                                precision=lax.Precision.HIGHEST) + blk["cb1"], 0.0)
        s = jax.nn.sigmoid(jnp.dot(z, blk["cw2"],
                                   precision=lax.Precision.HIGHEST) + blk["cb2"])
        res = h * s[:, :, None, None] + res
    return _conv3x3_ref(res, wf, bf) + x


# ----------------------------------------------------------------------------
# Deterministic parameter init (synthetic; shapes match the PyTorch module).
# Conv weights are stored flat as (9*C, C) == (dy, dx, cin) x cout.
# ----------------------------------------------------------------------------
def init_params(key, C, reduction, n_resblocks):
    Cr = C // reduction
    blocks = []
    for _ in range(n_resblocks):
        keys = jax.random.split(key, 9)
        key = keys[0]
        blocks.append({
            "w1": 0.05 * jax.random.normal(keys[1], (9 * C, C), jnp.float32),
            "b1": 0.01 * jax.random.normal(keys[2], (1, C), jnp.float32),
            "w2": 0.05 * jax.random.normal(keys[3], (9 * C, C), jnp.float32),
            "b2": 0.01 * jax.random.normal(keys[4], (1, C), jnp.float32),
            "cw1": 0.10 * jax.random.normal(keys[5], (C, Cr), jnp.float32),
            "cb1": 0.01 * jax.random.normal(keys[6], (1, Cr), jnp.float32),
            "cw2": 0.10 * jax.random.normal(keys[7], (Cr, C), jnp.float32),
            "cb2": 0.01 * jax.random.normal(keys[8], (1, C), jnp.float32),
        })
    k1, k2 = jax.random.split(key)
    wf = 0.05 * jax.random.normal(k1, (9 * C, C), jnp.float32)
    bf = 0.01 * jax.random.normal(k2, (1, C), jnp.float32)
    return blocks, wf, bf


if __name__ == "__main__":
    # ResidualGroup(conv=default_conv, n_feat=16, kernel_size=3, reduction=4,
    #               act=ReLU, res_scale=1, n_resblocks=2)
    N, C, H, W = 2, 16, 16, 16
    reduction, n_resblocks = 4, 2

    key = jax.random.PRNGKey(0)
    kx, kp = jax.random.split(key)
    x = jax.random.normal(kx, (N, C, H, W), jnp.float32)     # NCHW, PyTorch layout

    blocks, wf, bf = init_params(kp, C, reduction, n_resblocks)

    roll_np = _roll_matches_numpy()                          # one-time probe
    fwd = jax.jit(functools.partial(residual_group_pallas,
                                    roll_np_convention=roll_np))
    out = jax.block_until_ready(fwd(x, blocks, wf, bf))

    ref = residual_group_ref(x, blocks, wf, bf)
    # bf16 MXU operands vs f32-HIGHEST reference -> slightly looser tolerance.
    np.testing.assert_allclose(np.asarray(out), np.asarray(ref),
                               rtol=2e-2, atol=2e-2)
    assert out.shape == (N, C, H, W)
    print("KERNEL_OK")
</pallas_src>

<mosaic_0001>
module attributes {stable_mosaic.version = 11 : i64} {
  func.func @_probe(%arg0: memref<8x128xf32, #tpu.memory_space<vmem>>, %arg1: memref<8x128xf32, #tpu.memory_space<vmem>>) attributes {dimension_semantics = [], scalar_prefetch = 0 : i64, scratch_operands = 0 : i64, tpu.core_type = #tpu.core_type<tc>} {
    %c0 = arith.constant 0 : index
    %c0_0 = arith.constant 0 : index
    %0 = vector.load %arg0[%c0, %c0_0] : memref<8x128xf32, #tpu.memory_space<vmem>>, vector<8x128xf32>
    %c1_i32 = arith.constant 1 : i32
    %1 = tpu.dynamic_rotate %0 by %c1_i32 dim 1 : vector<8x128xf32>, i32 -> vector<8x128xf32>
    %c0_1 = arith.constant 0 : index
    %c0_2 = arith.constant 0 : index
    %2 = vector.load %arg1[%c0_1, %c0_2] : memref<8x128xf32, #tpu.memory_space<vmem>>, vector<8x128xf32>
    tpu.vector_store %arg1[%c0_1, %c0_2], %1 {strides = array<i32>} : memref<8x128xf32, #tpu.memory_space<vmem>>, vector<8x128xf32>,
    return
  }
}

</mosaic_0001>

<bundles_post_ra>
// kernel: tpu_custom_call.1
= control target key start
LH: loop header
LB: loop body
LE: loop exit
PB: predicated region body
PF: predicated region fallthrough
CT: control target
= control target key end

     0   :  { %6 = vsyncpa [#allocation3], 0  ;;  %s106_s0 = inlined_call_operand.hbm [shape: f32[8,128], index: 0, kind: input, shape index: {}]   ;;  %s107_s1 = inlined_call_operand.hbm [shape: f32[8,128], index: 1, kind: output, shape index: {}]  }
   0x1   :  { %7 = vsyncpa [#allocation4], 0  ;;  %s87_s6 = smov [#allocation2]  }
   0x2   :  { %s14_s7 = sshll.u32 %s87_s6, 4  ;;  %s15_s7 = int_to_ptr.vmem [resolvable:$true] %s14_s7 }
   0x3   :  { %s51_s8 = scalar_lea.vmem %s15_s7, 128  ;;  %p56_p1 = scmp.lt.s32.totalorder %s15_s7, %s15_s7 }
   0x4   :  { %p52_p0 = scmp.ne.s32.totalorder %s15_s7, %s51_s8  ;;  %p57_p2 = scmp.lt.s32.totalorder %s51_s8, %s51_s8 }
   0x6   :  { %p58_p3 = por %p57_p2, %p56_p1 }
   0x8   :  { %p59_p4 = pnand %p58_p3, %p52_p0 }
   0xa   :  { %62 = shalt.err (!%p59_p4)
}
   0xb   :  { %17 = dma.hbm_to_vmem [thread:$0]  %s106_s0, 128, %s15_s7, [#allocation3]  }
   0xc   :  { %83 = dma.done.wait [#allocation3], 128  }
   0xd   :  { %84 = vsyncadd [#allocation3], 4294967168  ;;  %v21_v0 = vld [vmem:[#allocation2] sm:$0xff]  ;;  %s88_s11 = smov 1   ;;  %s89_s12 = smov [#allocation5]  }
   0xe   :  { %22 = vrot.lane.b32.xlu0 %v21_v0, %s88_s11  ;;  %s31_s13 = sshll.u32 %s89_s12, 4  ;;  %s32_s13 = int_to_ptr.vmem [resolvable:$true] %s31_s13 }
   0xf   :  { %s63_s14 = scalar_lea.vmem %s32_s13, 128  ;;  %p68_p6 = scmp.lt.s32.totalorder %s32_s13, %s32_s13 }
  0x10   :  { %p64_p5 = scmp.ne.s32.totalorder %s32_s13, %s63_s14  ;;  %p69_p7 = scmp.lt.s32.totalorder %s63_s14, %s63_s14 }
  0x12   :  { %p70_p8 = por %p69_p7, %p68_p6 }
  0x14   :  { %p71_p9 = pnand %p70_p8, %p64_p5 }
  0x80   :  { %v23_v1 = vpop.permute.xlu0 %22 }
  0x81   :  { %24 = vst [vmem:[#allocation5] sm:$0xff] %v23_v1 }
  0x82   :  { %74 = shalt.err (!%p71_p9)
}
  0x83   :  { %34 = dma.vmem_to_hbm [thread:$0]  %s32_s13, 128, %s107_s1, [#allocation4]  }
  0x84   :  { %85 = dma.done.wait [#allocation4], 128  }
  0x85   :  { %86 = vsyncadd [#allocation4], 4294967168 }
  0x86   :  { %38 = vsyncpa [#allocation3], 1 }
  0x87   :  { %39 = vsyncpa [#allocation4], 1 }

</bundles_post_ra>
